<compile_context>
chip_gen: v5e
topology: v5e:2x2
jax: 0.10.0
libtpu: 0.0.40
codegen_flags: <defaults>
</compile_context>

<pallas_src>
import functools

import jax
import jax.numpy as jnp
from jax.experimental import pallas as pl
from jax.experimental.pallas import tpu as pltpu


def mlp_kernel(x_ref, w1_ref, b1_ref, w2_ref, b2_ref, o_ref):
    # Cast the x tile to bf16 in-kernel (VPU) right before the MXU op; avoids a
    # separate HBM cast pass in the wrapper.
    x = x_ref[...].astype(jnp.bfloat16)
    # linear1: [tb, D]bf16 @ [D, H]bf16 -> [tb, H]f32 (MXU, f32 accumulation)
    h = jnp.dot(x, w1_ref[...], preferred_element_type=jnp.float32)
    h = jnp.maximum(h + b1_ref[...], 0.0)            # bias + ReLU
    # Dropout: identity in eval mode (inference forward).
    # TODO(synk): training-mode dropout (pltpu.prng_seed/prng_random_bits mask
    #             + 1/(1-p) scaling) not emitted here; kernel is inference-only.
    # linear2: [tb, H]bf16 @ [H, C]bf16 -> [tb, C]f32
    out = jnp.dot(h.astype(w2_ref.dtype), w2_ref[...],
                  preferred_element_type=jnp.float32)
    o_ref[...] = (out + b2_ref[...]).astype(o_ref.dtype)


def _round_up(v, m):
    return ((v + m - 1) // m) * m


def _vmem_cap_bytes():
    """Trace-time query of the chip's VMEM capacity; conservative fallback."""
    try:
        return int(pltpu.get_tpu_info().vmem_capacity_bytes)
    except Exception:
        return 64 << 20          # v7x has the smallest VMEM per TensorCore


def _vmem_footprint_terms(D, H, C):
    """Per-row and resident VMEM byte estimates (physical lane/sublane padded)."""
    D_a = _round_up(D, 128)
    H_a = _round_up(H, 128)
    C_a = _round_up(C, 128)
    # Resident operands: pipeline allocates 2 buffers per input by default, so
    # count weights at 2x (honest budget instead of pipeline_mode tweaks).
    weight_bytes = 2 * (D_a * H_a * 2 + H_a * C_a * 2 + H_a * 4 + C_a * 4)
    # Per batch row: double-buffered f32 x tile + double-buffered f32 out tile
    # + f32 hidden intermediate + bf16 hidden copy.
    per_row = 2 * D_a * 4 + 2 * C_a * 4 + H_a * 4 + H_a * 2
    return per_row, weight_bytes


def _choose_tb(B, D, H, C, vmem_cap):
    """Batch tile: whole batch in one tile when it fits, else big MXU-friendly tiles."""
    B_pad = _round_up(B, 8)                       # f32 sublane requirement
    per_row, weight_bytes = _vmem_footprint_terms(D, H, C)
    budget = int(0.6 * vmem_cap) - weight_bytes
    max_rows = max(8, (budget // max(per_row, 1)) // 8 * 8)
    if B_pad <= max_rows:
        return B_pad                              # grid=(1,): no pipeline overhead
    # Large batch: cap at 512 rows (v6e roofline sweet spot); keep a multiple of
    # 128 rows so each step (and each v7x core, if split) fills the MXU M dim.
    tb = min(512, max_rows)
    if tb >= 128:
        tb = (tb // 128) * 128
    else:
        tb = max(8, (tb // 8) * 8)
    return tb


@functools.partial(jax.jit, static_argnames=("tb",))
def mlr_forward(x, w1, b1, w2, b2, *, tb=None):
    B, D = x.shape
    H = w1.shape[1]
    C = w2.shape[1]
    out_dtype = x.dtype

    vmem_cap = _vmem_cap_bytes()
    if tb is None:
        tb = _choose_tb(B, D, H, C, vmem_cap)
    assert tb % 8 == 0, "batch tile must be a multiple of 8 (f32 sublane)"

    B_pad = _round_up(B, tb)
    grid = B_pad // tb

    # --- wrapper-side prep (fused under jit): weight casts, optional row pad ---
    x_in = x if B_pad == B else jnp.pad(x, ((0, B_pad - B), (0, 0)))
    w1_bf = w1.astype(jnp.bfloat16)
    w2_bf = w2.astype(jnp.bfloat16)
    b1_2d = b1.reshape(1, H).astype(jnp.float32)
    b2_2d = b2.reshape(1, C).astype(jnp.float32)

    # --- generation-aware VMEM limit with headroom ---
    per_row, weight_bytes = _vmem_footprint_terms(D, H, C)
    vmem_needed = weight_bytes + tb * per_row + (2 << 20)
    vmem_limit = int(min(max(vmem_needed, 8 << 20), int(0.75 * vmem_cap)))

    cost = pl.CostEstimate(
        flops=2 * B_pad * (D * H + H * C),
        transcendentals=0,
        bytes_accessed=(B_pad * D * 4 + B_pad * C * 4
                        + D * H * 2 + H * C * 2 + H * 4 + C * 4),
    )

    # Megacore split only pays off when each core gets an MXU-friendly tile.
    dim_sem = ("parallel",) if (grid > 1 and tb >= 128) else ("arbitrary",)

    out_padded = pl.pallas_call(
        mlp_kernel,
        out_shape=jax.ShapeDtypeStruct((B_pad, C), out_dtype),
        grid_spec=pltpu.PrefetchScalarGridSpec(
            num_scalar_prefetch=0,
            grid=(grid,),
            in_specs=[
                pl.BlockSpec((tb, D), lambda i: (i, 0)),   # x tile (pipelined, f32)
                pl.BlockSpec((D, H), lambda i: (0, 0)),    # w1 (resident, bf16)
                pl.BlockSpec((1, H), lambda i: (0, 0)),    # b1 (resident, f32)
                pl.BlockSpec((H, C), lambda i: (0, 0)),    # w2 (resident, bf16)
                pl.BlockSpec((1, C), lambda i: (0, 0)),    # b2 (resident, f32)
            ],
            out_specs=pl.BlockSpec((tb, C), lambda i: (i, 0)),  # unpadded C width
        ),
        compiler_params=pltpu.CompilerParams(
            dimension_semantics=dim_sem,
            vmem_limit_bytes=vmem_limit,
        ),
        cost_estimate=cost,
    )(x_in, w1_bf, b1_2d, w2_bf, b2_2d)

    # Strip batch padding (no column padding anymore); fuses under jit.
    return out_padded if B_pad == B else out_padded[:B]


def reference_forward(x, w1, b1, w2, b2):
    h = jnp.maximum(x @ w1 + b1, 0.0)
    return h @ w2 + b2


if __name__ == "__main__":
    # Shapes consistent with the module (hidden_size = 512 as in the spec).
    batch = 64
    input_size = 32
    hidden_size = 512
    num_classes = 10

    key = jax.random.PRNGKey(0)
    kx, kw1, kb1, kw2, kb2 = jax.random.split(key, 5)

    # Deterministic synthetic parameters (mimicking nn.Linear's uniform init range).
    bound1 = 1.0 / (input_size ** 0.5)
    bound2 = 1.0 / (hidden_size ** 0.5)
    x = jax.random.normal(kx, (batch, input_size), dtype=jnp.float32)
    w1 = jax.random.uniform(kw1, (input_size, hidden_size), jnp.float32, -bound1, bound1)
    b1 = jax.random.uniform(kb1, (hidden_size,), jnp.float32, -bound1, bound1)
    w2 = jax.random.uniform(kw2, (hidden_size, num_classes), jnp.float32, -bound2, bound2)
    b2 = jax.random.uniform(kb2, (num_classes,), jnp.float32, -bound2, bound2)

    out = mlr_forward(x, w1, b1, w2, b2)
    out = jax.block_until_ready(out)

    ref = reference_forward(x, w1, b1, w2, b2)
    assert out.shape == (batch, num_classes), out.shape
    # bf16 MXU weight operands with f32 accumulation => loosened tolerance vs
    # the f32 reference (acceptable for logits; argmax flips only for ~1e-2 ties).
    assert jnp.allclose(out, ref, atol=2e-2, rtol=2e-2), "mismatch vs reference"

    print("KERNEL_OK")
</pallas_src>

<mosaic_0001>
module attributes {stable_mosaic.version = 11 : i64} {
  func.func @mlp_kernel(%arg0: i32, %arg1: memref<64x32xf32, #tpu.memory_space<vmem>>, %arg2: memref<32x512xbf16, #tpu.memory_space<vmem>>, %arg3: memref<1x512xf32, #tpu.memory_space<vmem>>, %arg4: memref<512x10xbf16, #tpu.memory_space<vmem>>, %arg5: memref<1x10xf32, #tpu.memory_space<vmem>>, %arg6: memref<64x10xf32, #tpu.memory_space<vmem>>) attributes {dimension_semantics = [#tpu.dimension_semantics<arbitrary>], iteration_bounds = array<i64: 1>, scalar_prefetch = 0 : i64, scratch_operands = 0 : i64, tpu.core_type = #tpu.core_type<tc>, window_params = [{transform_indices = @transform_0, window_bounds = array<i64: 64, 32>}, {pipeline_mode = #tpu.pipeline_mode<synchronous>, transform_indices = @transform_1, window_bounds = array<i64: 32, 512>}, {pipeline_mode = #tpu.pipeline_mode<synchronous>, transform_indices = @transform_2, window_bounds = array<i64: 1, 512>}, {pipeline_mode = #tpu.pipeline_mode<synchronous>, transform_indices = @transform_3, window_bounds = array<i64: 512, 10>}, {pipeline_mode = #tpu.pipeline_mode<synchronous>, transform_indices = @transform_4, window_bounds = array<i64: 1, 10>}, {transform_indices = @transform_5, window_bounds = array<i64: 64, 10>}]} {
    %c0 = arith.constant 0 : index
    %c0_0 = arith.constant 0 : index
    %0 = vector.load %arg1[%c0, %c0_0] : memref<64x32xf32, #tpu.memory_space<vmem>>, vector<64x32xf32>
    %1 = arith.truncf %0 : vector<64x32xf32> to vector<64x32xbf16>
    %c0_1 = arith.constant 0 : index
    %c0_2 = arith.constant 0 : index
    %2 = vector.load %arg2[%c0_1, %c0_2] : memref<32x512xbf16, #tpu.memory_space<vmem>>, vector<32x512xbf16>
    %cst = arith.constant dense<0.000000e+00> : vector<64x512xf32>
    %3 = tpu.matmul %1, %2, %cst {dimension_numbers = #tpu.dot_dimension_numbers<[1], [0], [0], [1], [0, 0, 1, 1], [], []>} : vector<64x32xbf16>, vector<32x512xbf16>, vector<64x512xf32> -> vector<64x512xf32>
    %c0_3 = arith.constant 0 : index
    %c0_4 = arith.constant 0 : index
    %4 = vector.load %arg3[%c0_3, %c0_4] : memref<1x512xf32, #tpu.memory_space<vmem>>, vector<1x512xf32>
    %5 = vector.broadcast %4 : vector<1x512xf32> to vector<64x512xf32>
    %6 = arith.addf %3, %5 : vector<64x512xf32>
    %cst_5 = arith.constant 0.000000e+00 : f32
    %7 = vector.broadcast %cst_5 : f32 to vector<64x512xf32>
    %8 = arith.maximumf %6, %7 : vector<64x512xf32>
    %9 = arith.truncf %8 : vector<64x512xf32> to vector<64x512xbf16>
    %c0_6 = arith.constant 0 : index
    %c0_7 = arith.constant 0 : index
    %10 = vector.load %arg4[%c0_6, %c0_7] : memref<512x10xbf16, #tpu.memory_space<vmem>>, vector<512x10xbf16>
    %cst_8 = arith.constant dense<0.000000e+00> : vector<64x10xf32>
    %11 = tpu.matmul %9, %10, %cst_8 {dimension_numbers = #tpu.dot_dimension_numbers<[1], [0], [0], [1], [0, 0, 1, 1], [], []>} : vector<64x512xbf16>, vector<512x10xbf16>, vector<64x10xf32> -> vector<64x10xf32>
    %c0_9 = arith.constant 0 : index
    %c0_10 = arith.constant 0 : index
    %12 = vector.load %arg5[%c0_9, %c0_10] : memref<1x10xf32, #tpu.memory_space<vmem>>, vector<1x10xf32>
    %13 = vector.broadcast %12 : vector<1x10xf32> to vector<64x10xf32>
    %14 = arith.addf %11, %13 : vector<64x10xf32>
    %c0_11 = arith.constant 0 : index
    %c0_12 = arith.constant 0 : index
    %15 = vector.load %arg6[%c0_11, %c0_12] : memref<64x10xf32, #tpu.memory_space<vmem>>, vector<64x10xf32>
    tpu.vector_store %arg6[%c0_11, %c0_12], %14 {strides = array<i32>} : memref<64x10xf32, #tpu.memory_space<vmem>>, vector<64x10xf32>,
    return
  }
  func.func @transform_0(%arg0: i32) -> (i32, i32) {
    %c0_i32 = arith.constant 0 : i32
    %c0_i32_0 = arith.constant 0 : i32
    return %arg0, %c0_i32 : i32, i32
  }
  func.func @transform_1(%arg0: i32) -> (i32, i32) {
    %c0_i32 = arith.constant 0 : i32
    %c0_i32_0 = arith.constant 0 : i32
    %c0_i32_1 = arith.constant 0 : i32
    return %c0_i32, %c0_i32_0 : i32, i32
  }
  func.func @transform_2(%arg0: i32) -> (i32, i32) {
    %c0_i32 = arith.constant 0 : i32
    %c0_i32_0 = arith.constant 0 : i32
    %c0_i32_1 = arith.constant 0 : i32
    return %c0_i32, %c0_i32_0 : i32, i32
  }
  func.func @transform_3(%arg0: i32) -> (i32, i32) {
    %c0_i32 = arith.constant 0 : i32
    %c0_i32_0 = arith.constant 0 : i32
    %c0_i32_1 = arith.constant 0 : i32
    return %c0_i32, %c0_i32_0 : i32, i32
  }
  func.func @transform_4(%arg0: i32) -> (i32, i32) {
    %c0_i32 = arith.constant 0 : i32
    %c0_i32_0 = arith.constant 0 : i32
    %c0_i32_1 = arith.constant 0 : i32
    return %c0_i32, %c0_i32_0 : i32, i32
  }
  func.func @transform_5(%arg0: i32) -> (i32, i32) {
    %c0_i32 = arith.constant 0 : i32
    %c0_i32_0 = arith.constant 0 : i32
    return %arg0, %c0_i32 : i32, i32
  }
}

</mosaic_0001>

<bundles_post_ra>
// kernel: mlr_forward.1
= control target key start
LH: loop header
LB: loop body
LE: loop exit
PB: predicated region body
PF: predicated region fallthrough
CT: control target
= control target key end

     0   :  { %vm91_vm0 = vcmask 261120   ;;  %vm644_vm1 = vcmask 80896   ;;  %s1176_s1 = inlined_call_operand.vmem [shape: bf16[32,512], index: 1, kind: input, shape index: {}]   ;;  %s1177_s0 = inlined_call_operand.vmem [shape: f32[64,32], index: 0, kind: input, shape index: {}]   ;;  %s1178_s3 = inlined_call_operand.vmem [shape: bf16[512,10], index: 3, kind: input, shape index: {}]   ;;  %s1179_s4 = inlined_call_operand.vmem [shape: f32[1,10], index: 4, kind: input, shape index: {}]   ;;  %s1180_s2 = inlined_call_operand.vmem [shape: f32[1,512], index: 2, kind: input, shape index: {}]   ;;  %s1181_s5 = inlined_call_operand.vmem [shape: f32[64,10], index: 5, kind: output, shape index: {}]  }
   0x1   :  { %v675_v0 = vld [vmem:[%s1176_s1 + $0x20] sm:$0xf]  ;;  %v839_v1 = vld [vmem:[%s1176_s1 + $0x2c] sm:$0xf0]  ;;  %v837_v2 = vld [vmem:[%s1176_s1 + $0x24] sm:$0xf] }
   0x2   :  { %v676_v3 = vor.u32 %v839_v1, %v675_v0  ;;  %v677_v4 = vld [vmem:[%s1176_s1 + $0x30] sm:$0xf0]  ;;  %v683_v5 = vld [vmem:[%s1176_s1 + $0x28] sm:$0xf]  ;;  %v840_v6 = vld [vmem:[%s1176_s1 + $0x34] sm:$0xf0] }
   0x3   :  { %v680_v7 = vor.u32 %v837_v2, %v677_v4  ;;  %v684_v8 = vor.u32 %v840_v6, %v683_v5  ;;  %v838_v9 = vld [vmem:[%s1176_s1 + $0x2c] sm:$0xf]  ;;  %v685_v10 = vld [vmem:[%s1176_s1 + $0x38] sm:$0xf0]  ;;  %v659_v11 = vld [vmem:[%s1176_s1] sm:$0xf] }
   0x4   :  { %110 = vmatpush.bf16.msra.mxu0 %v676_v3  ;;  %v688_v12 = vor.u32 %v838_v9, %v685_v10  ;;  %v835_v13 = vld [vmem:[%s1176_s1 + $0xc] sm:$0xf0]  ;;  %v833_v14 = vld [vmem:[%s1176_s1 + $0x4] sm:$0xf]  ;;  %v661_v15 = vld [vmem:[%s1176_s1 + $0x10] sm:$0xf0] }
   0x5   :  { %139 = vmatpush.bf16.msra.mxu1 %v680_v7  ;;  %168 = vmatpush.bf16.msra.mxu2 %v684_v8  ;;  %v660_v16 = vor.u32 %v835_v13, %v659_v11  ;;  %v664_v17 = vor.u32 %v833_v14, %v661_v15  ;;  %v667_v18 = vld [vmem:[%s1176_s1 + $0x8] sm:$0xf]  ;;  %v836_v19 = vld [vmem:[%s1176_s1 + $0x14] sm:$0xf0]  ;;  %v834_v20 = vld [vmem:[%s1176_s1 + $0xc] sm:$0xf] }
   0x6   :  { %197 = vmatpush.bf16.msra.mxu3 %v688_v12  ;;  %v668_v21 = vor.u32 %v836_v19, %v667_v18  ;;  %v669_v22 = vld [vmem:[%s1176_s1 + $0x18] sm:$0xf0]  ;;  %v21_v23 = vld [vmem:[%s1177_s0] sm:$0xff]  ;;  %v22_v24 = vld [vmem:[%s1177_s0 + $0x8] sm:$0xff] }
   0x7   :  { %v672_v25 = vor.u32 %v834_v20, %v669_v22  ;;  %v29_v26 = vpack.c.bf16 %v22_v24, %v21_v23  ;;  %v23_v27 = vld [vmem:[%s1177_s0 + $0x10] sm:$0xff]  ;;  %v24_v28 = vld [vmem:[%s1177_s0 + $0x18] sm:$0xff]  ;;  %v25_v38 = vld [vmem:[%s1177_s0 + $0x20] sm:$0xff] }
   0x8   :  { %111 = vmatpush.bf16.msra.mxu0 %v660_v16  ;;  %v30_v29 = vpack.c.bf16 %v24_v28, %v23_v27  ;;  %v864_v30 = vld [vmem:[%s1178_s3 + $0xb8] sm:$0xff]  ;;  %v863_v34 = vld [vmem:[%s1178_s3 + $0xb0] sm:$0xff]  ;;  %v862_v39 = vld [vmem:[%s1178_s3 + $0xa8] sm:$0xff] }
   0x9   :  { %140 = vmatpush.bf16.msra.mxu1 %v664_v17  ;;  %169 = vmatpush.bf16.msra.mxu2 %v668_v21  ;;  %v848_v31 = vld [vmem:[%s1178_s3 + $0x38] sm:$0xff]  ;;  %v847_v35 = vld [vmem:[%s1178_s3 + $0x30] sm:$0xff]  ;;  %v846_v40 = vld [vmem:[%s1178_s3 + $0x28] sm:$0xff] }
   0xa   :  { %198 = vmatpush.bf16.msra.mxu3 %v672_v25  ;;  %v872_v32 = vld [vmem:[%s1178_s3 + $0xf8] sm:$0xff]  ;;  %v871_v36 = vld [vmem:[%s1178_s3 + $0xf0] sm:$0xff]  ;;  %v26_v41 = vld [vmem:[%s1177_s0 + $0x28] sm:$0xff] }
   0xb   :  { %689 = vmatmul.msk.bf16.vlgmr.msra.gmra.mxu0 %vm91_vm0, %v29_v26  ;;  %v856_v33 = vld [vmem:[%s1178_s3 + $0x78] sm:$0xff]  ;;  %v855_v37 = vld [vmem:[%s1178_s3 + $0x70] sm:$0xff]  ;;  %v870_v42 = vld [vmem:[%s1178_s3 + $0xe8] sm:$0xff]  ;;  %v31_v44 = vpack.c.bf16 %v26_v41, %v25_v38 }
   0xc   :  { %693 = vmatmul.msk.bf16.vlgmr.msra.gmra.mxu1 %vm91_vm0, %v29_v26  ;;  %697 = vmatmul.msk.bf16.vlgmr.msra.gmra.mxu2 %vm91_vm0, %v29_v26  ;;  %v854_v43 = vld [vmem:[%s1178_s3 + $0x68] sm:$0xff]  ;;  %v861_v45 = vld [vmem:[%s1178_s3 + $0xa0] sm:$0xff]  ;;  %v860_v49 = vld [vmem:[%s1178_s3 + $0x98] sm:$0xff] }
   0xd   :  { %701 = vmatmul.msk.bf16.vlgmr.msra.gmra.mxu3 %vm91_vm0, %v29_v26  ;;  %586 = vmatpush.bf16.msrb.mxu2 %v864_v30  ;;  %v845_v46 = vld [vmem:[%s1178_s3 + $0x20] sm:$0xff]  ;;  %v844_v50 = vld [vmem:[%s1178_s3 + $0x18] sm:$0xff]  ;;  %v859_v53 = vld [vmem:[%s1178_s3 + $0x90] sm:$0xff] }
   0xe   :  { %528 = vmatpush.bf16.msrb.mxu0 %v848_v31  ;;  %615 = vmatpush.bf16.msrb.mxu3 %v872_v32  ;;  %v869_v47 = vld [vmem:[%s1178_s3 + $0xe0] sm:$0xff]  ;;  %v868_v51 = vld [vmem:[%s1178_s3 + $0xd8] sm:$0xff]  ;;  %v843_v54 = vld [vmem:[%s1178_s3 + $0x10] sm:$0xff] }
   0xf   :  { %557 = vmatpush.bf16.msrb.mxu1 %v856_v33  ;;  %v853_v48 = vld [vmem:[%s1178_s3 + $0x60] sm:$0xff]  ;;  %v852_v52 = vld [vmem:[%s1178_s3 + $0x58] sm:$0xff]  ;;  %v867_v55 = vld [vmem:[%s1178_s3 + $0xd0] sm:$0xff] }
  0x10   :  { %v27_v56 = vld [vmem:[%s1177_s0 + $0x30] sm:$0xff]  ;;  %v28_v57 = vld [vmem:[%s1177_s0 + $0x38] sm:$0xff]  ;;  %v858_v60 = vld [vmem:[%s1178_s3 + $0x88] sm:$0xff] }
  0x11   :  { %587 = vmatpush.bf16.msrb.mxu2 %v863_v34  ;;  %v32_v58 = vpack.c.bf16 %v28_v57, %v27_v56  ;;  %v851_v59 = vld [vmem:[%s1178_s3 + $0x50] sm:$0xff]  ;;  %v842_v61 = vld [vmem:[%s1178_s3 + $0x8] sm:$0xff]  ;;  %v841_v0 = vld [vmem:[%s1178_s3] sm:$0xff] }
  0x12   :  { %529 = vmatpush.bf16.msrb.mxu0 %v847_v35  ;;  %616 = vmatpush.bf16.msrb.mxu3 %v871_v36  ;;  %v850_v62 = vld [vmem:[%s1178_s3 + $0x48] sm:$0xff]  ;;  %v849_v1 = vld [vmem:[%s1178_s3 + $0x40] sm:$0xff] }
  0x13   :  { %558 = vmatpush.bf16.msrb.mxu1 %v855_v37  ;;  %v866_v63 = vld [vmem:[%s1178_s3 + $0xc8] sm:$0xff]  ;;  %v857_v2 = vld [vmem:[%s1178_s3 + $0x80] sm:$0xff] }
  0x14   :  { %v865_v3 = vld [vmem:[%s1178_s3 + $0xc0] sm:$0xff] }
  0x15   :  { %588 = vmatpush.bf16.msrb.mxu2 %v862_v39  ;;  %v41_v4 = vld [vmem:[%s1180_s2] sm:$0xf] }
  0x16   :  { %530 = vmatpush.bf16.msrb.mxu0 %v846_v40  ;;  %617 = vmatpush.bf16.msrb.mxu3 %v870_v42  ;;  %v1091_v6 = vperm.slane %v41_v4, 0  ;;  %v1093_v8 = vperm.slane %v41_v4, 1  ;;  %v1098_v18 = vperm.slane %v41_v4, 2  ;;  %v1101_v20 = vperm.slane %v41_v4, 3 }
  0x17   :  { %559 = vmatpush.bf16.msrb.mxu1 %v854_v43 }
  0x19   :  { %589 = vmatpush.bf16.msrb.mxu2 %v861_v45 }
  0x1a   :  { %531 = vmatpush.bf16.msrb.mxu0 %v845_v46  ;;  %618 = vmatpush.bf16.msrb.mxu3 %v869_v47 }
  0x1b   :  { %690 = vmatmul.msk.bf16.gmra.mxu0 %vm91_vm0, %v30_v29  ;;  %560 = vmatpush.bf16.msrb.mxu1 %v853_v48 }
  0x1c   :  { %694 = vmatmul.msk.bf16.gmra.mxu1 %vm91_vm0, %v30_v29  ;;  %698 = vmatmul.msk.bf16.gmra.mxu2 %vm91_vm0, %v30_v29 }
  0x1d   :  { %702 = vmatmul.msk.bf16.gmra.mxu3 %vm91_vm0, %v30_v29  ;;  %590 = vmatpush.bf16.msrb.mxu2 %v860_v49 }
  0x1e   :  { %532 = vmatpush.bf16.msrb.mxu0 %v844_v50  ;;  %619 = vmatpush.bf16.msrb.mxu3 %v868_v51 }
  0x1f   :  { %561 = vmatpush.bf16.msrb.mxu1 %v852_v52 }
  0x21   :  { %591 = vmatpush.bf16.msrb.mxu2 %v859_v53 }
  0x22   :  { %533 = vmatpush.bf16.msrb.mxu0 %v843_v54  ;;  %620 = vmatpush.bf16.msrb.mxu3 %v867_v55 }
  0x23   :  { %562 = vmatpush.bf16.msrb.mxu1 %v851_v59 }
  0x25   :  { %592 = vmatpush.bf16.msrb.mxu2 %v858_v60 }
  0x26   :  { %534 = vmatpush.bf16.msrb.mxu0 %v842_v61  ;;  %621 = vmatpush.bf16.msrb.mxu3 %v866_v63 }
  0x27   :  { %563 = vmatpush.bf16.msrb.mxu1 %v850_v62 }
  0x29   :  { %593 = vmatpush.bf16.msrb.mxu2 %v857_v2 }
  0x2a   :  { %535 = vmatpush.bf16.msrb.mxu0 %v841_v0  ;;  %622 = vmatpush.bf16.msrb.mxu3 %v865_v3 }
  0x2b   :  { %691 = vmatmul.msk.bf16.gmra.mxu0 %vm91_vm0, %v31_v44  ;;  %564 = vmatpush.bf16.msrb.mxu1 %v849_v1 }
  0x2c   :  { %695 = vmatmul.msk.bf16.gmra.mxu1 %vm91_vm0, %v31_v44  ;;  %699 = vmatmul.msk.bf16.gmra.mxu2 %vm91_vm0, %v31_v44 }
  0x2d   :  { %703 = vmatmul.msk.bf16.gmra.mxu3 %vm91_vm0, %v31_v44 }
  0x3b   :  { %692 = vmatmul.msk.bf16.gmra.mxu0 %vm91_vm0, %v32_v58 }
  0x3c   :  { %696 = vmatmul.msk.bf16.gmra.mxu1 %vm91_vm0, %v32_v58  ;;  %700 = vmatmul.msk.bf16.gmra.mxu2 %vm91_vm0, %v32_v58 }
  0x3d   :  { %704 = vmatmul.msk.bf16.gmra.mxu3 %vm91_vm0, %v32_v58 }
  0x88   :  { %v113_v5 = vpop.f32.mrf.mxu0 }
  0x89   :  { %v142_v7 = vpop.f32.mrf.mxu1  ;;  %v114_v9 = vadd.f32 %v113_v5, %v1091_v6 }
  0x8a   :  { %v143_v10 = vadd.f32 %v142_v7, %v1093_v8 }
  0x8b   :  { %v220_v14 = vmax.f32 %v114_v9, 0.0 }
  0x8c   :  { %v221_v17 = vmax.f32 %v143_v10, 0.0 }
  0x8f   :  { %v171_v11 = vpop.f32.mrf.mxu2 }
  0x90   :  { %v200_v12 = vpop.f32.mrf.mxu3  ;;  %v115_v13 = vpop.f32.mrf.mxu0  ;;  %v172_v24 = vadd.f32 %v171_v11, %v1098_v18 }
  0x91   :  { %v116_v15 = vadd.f32 %v115_v13, %v1091_v6  ;;  %v144_v16 = vpop.f32.mrf.mxu1  ;;  %v201_v26 = vadd.f32 %v200_v12, %v1101_v20 }
  0x92   :  { %v145_v19 = vadd.f32 %v144_v16, %v1093_v8  ;;  %v222_v33 = vmax.f32 %v172_v24, 0.0 }
  0x93   :  { %v224_v21 = vmax.f32 %v116_v15, 0.0  ;;  %v223_v35 = vmax.f32 %v201_v26, 0.0 }
  0x94   :  { %v225_v22 = vmax.f32 %v145_v19, 0.0 }
  0x95   :  { %v252_v23 = vpack.c.bf16 %v224_v21, %v220_v14 }
  0x96   :  { %v253_v25 = vpack.c.bf16 %v225_v22, %v221_v17 }
  0x97   :  { %v173_v27 = vpop.f32.mrf.mxu2  ;;  %536 = vmatmul.bf16.vlgmr.msrb.gmra.mxu0 %v252_v23 }
  0x98   :  { %v174_v28 = vadd.f32 %v173_v27, %v1098_v18  ;;  %v202_v29 = vpop.f32.mrf.mxu3  ;;  %565 = vmatmul.bf16.vlgmr.msrb.gmra.mxu1 %v253_v25  ;;  %v118_v30 = vpop.f32.mrf.mxu0 }
  0x99   :  { %v203_v31 = vadd.f32 %v202_v29, %v1101_v20  ;;  %v147_v32 = vpop.f32.mrf.mxu1  ;;  %v119_v39 = vadd.f32 %v118_v30, %v1091_v6 }
  0x9a   :  { %v226_v34 = vmax.f32 %v174_v28, 0.0  ;;  %v148_v40 = vadd.f32 %v147_v32, %v1093_v8 }
  0x9b   :  { %v227_v36 = vmax.f32 %v203_v31, 0.0  ;;  %v228_v44 = vmax.f32 %v119_v39, 0.0 }
  0x9c   :  { %v254_v37 = vpack.c.bf16 %v226_v34, %v222_v33  ;;  %v229_v47 = vmax.f32 %v148_v40, 0.0 }
  0x9d   :  { %v255_v38 = vpack.c.bf16 %v227_v36, %v223_v35 }
  0x9e   :  { %594 = vmatmul.bf16.vlgmr.msrb.gmra.mxu2 %v254_v37 }
  0x9f   :  { %623 = vmatmul.bf16.vlgmr.msrb.gmra.mxu3 %v255_v38  ;;  %v176_v41 = vpop.f32.mrf.mxu2 }
  0xa0   :  { %v205_v42 = vpop.f32.mrf.mxu3  ;;  %v120_v43 = vpop.f32.mrf.mxu0  ;;  %v177_v52 = vadd.f32 %v176_v41, %v1098_v18 }
  0xa1   :  { %v121_v45 = vadd.f32 %v120_v43, %v1091_v6  ;;  %v149_v46 = vpop.f32.mrf.mxu1  ;;  %v206_v54 = vadd.f32 %v205_v42, %v1101_v20 }
  0xa2   :  { %v150_v48 = vadd.f32 %v149_v46, %v1093_v8  ;;  %v230_v61 = vmax.f32 %v177_v52, 0.0 }
  0xa3   :  { %v232_v49 = vmax.f32 %v121_v45, 0.0  ;;  %v231_v63 = vmax.f32 %v206_v54, 0.0 }
  0xa4   :  { %v233_v50 = vmax.f32 %v150_v48, 0.0 }
  0xa5   :  { %v256_v51 = vpack.c.bf16 %v232_v49, %v228_v44 }
  0xa6   :  { %v257_v53 = vpack.c.bf16 %v233_v50, %v229_v47 }
  0xa7   :  { %v178_v55 = vpop.f32.mrf.mxu2  ;;  %541 = vmatmul.bf16.gmra.mxu0 %v256_v51 }
  0xa8   :  { %v179_v56 = vadd.f32 %v178_v55, %v1098_v18  ;;  %v207_v57 = vpop.f32.mrf.mxu3  ;;  %570 = vmatmul.bf16.gmra.mxu1 %v257_v53  ;;  %v123_v58 = vpop.f32.mrf.mxu0 }
  0xa9   :  { %v208_v59 = vadd.f32 %v207_v57, %v1101_v20  ;;  %v152_v60 = vpop.f32.mrf.mxu1  ;;  %v124_v2 = vadd.f32 %v123_v58, %v1091_v6 }
  0xaa   :  { %v234_v62 = vmax.f32 %v179_v56, 0.0  ;;  %v153_v4 = vadd.f32 %v152_v60, %v1093_v8 }
  0xab   :  { %v235_v0 = vmax.f32 %v208_v59, 0.0  ;;  %v236_v10 = vmax.f32 %v124_v2, 0.0 }
  0xac   :  { %v258_v1 = vpack.c.bf16 %v234_v62, %v230_v61  ;;  %v237_v13 = vmax.f32 %v153_v4, 0.0  ;;  %v1134_v61 = vld [vmem:[%s1179_s4] ss:$0 sm:$0xff] }
  0xad   :  { %v259_v3 = vpack.c.bf16 %v235_v0, %v231_v63 }
  0xae   :  { %599 = vmatmul.bf16.gmra.mxu2 %v258_v1 }
  0xaf   :  { %628 = vmatmul.bf16.gmra.mxu3 %v259_v3  ;;  %v181_v5 = vpop.f32.mrf.mxu2 }
  0xb0   :  { %v210_v7 = vpop.f32.mrf.mxu3  ;;  %v125_v9 = vpop.f32.mrf.mxu0  ;;  %v182_v19 = vadd.f32 %v181_v5, %v1098_v18 }
  0xb1   :  { %v126_v11 = vadd.f32 %v125_v9, %v1091_v6  ;;  %v154_v12 = vpop.f32.mrf.mxu1  ;;  %v211_v22 = vadd.f32 %v210_v7, %v1101_v20 }
  0xb2   :  { %v155_v14 = vadd.f32 %v154_v12, %v1093_v8  ;;  %v238_v29 = vmax.f32 %v182_v19, 0.0 }
  0xb3   :  { %v240_v15 = vmax.f32 %v126_v11, 0.0  ;;  %v239_v31 = vmax.f32 %v211_v22, 0.0 }
  0xb4   :  { %v241_v16 = vmax.f32 %v155_v14, 0.0 }
  0xb5   :  { %v260_v17 = vpack.c.bf16 %v240_v15, %v236_v10 }
  0xb6   :  { %v261_v21 = vpack.c.bf16 %v241_v16, %v237_v13 }
  0xb7   :  { %v183_v23 = vpop.f32.mrf.mxu2  ;;  %546 = vmatmul.bf16.gmra.mxu0 %v260_v17 }
  0xb8   :  { %v184_v24 = vadd.f32 %v183_v23, %v1098_v18  ;;  %v212_v25 = vpop.f32.mrf.mxu3  ;;  %575 = vmatmul.bf16.gmra.mxu1 %v261_v21  ;;  %v128_v26 = vpop.f32.mrf.mxu0 }
  0xb9   :  { %v213_v27 = vadd.f32 %v212_v25, %v1101_v20  ;;  %v157_v28 = vpop.f32.mrf.mxu1  ;;  %v129_v34 = vadd.f32 %v128_v26, %v1091_v6 }
  0xba   :  { %v242_v30 = vmax.f32 %v184_v24, 0.0  ;;  %v158_v36 = vadd.f32 %v157_v28, %v1093_v8 }
  0xbb   :  { %v243_v32 = vmax.f32 %v213_v27, 0.0  ;;  %v244_v40 = vmax.f32 %v129_v34, 0.0 }
  0xbc   :  { %v262_v33 = vpack.c.bf16 %v242_v30, %v238_v29  ;;  %v245_v43 = vmax.f32 %v158_v36, 0.0 }
  0xbd   :  { %v263_v35 = vpack.c.bf16 %v243_v32, %v239_v31 }
  0xbe   :  { %604 = vmatmul.bf16.gmra.mxu2 %v262_v33 }
  0xbf   :  { %633 = vmatmul.bf16.gmra.mxu3 %v263_v35  ;;  %v186_v37 = vpop.f32.mrf.mxu2 }
  0xc0   :  { %v215_v38 = vpop.f32.mrf.mxu3  ;;  %v130_v39 = vpop.f32.mrf.mxu0  ;;  %v187_v48 = vadd.f32 %v186_v37, %v1098_v18 }
  0xc1   :  { %v131_v41 = vadd.f32 %v130_v39, %v1091_v6  ;;  %v159_v42 = vpop.f32.mrf.mxu1  ;;  %v216_v50 = vadd.f32 %v215_v38, %v1101_v20 }
  0xc2   :  { %v160_v44 = vadd.f32 %v159_v42, %v1093_v8  ;;  %v246_v54 = vmax.f32 %v187_v48, 0.0 }
  0xc3   :  { %v248_v45 = vmax.f32 %v131_v41, 0.0  ;;  %v247_v56 = vmax.f32 %v216_v50, 0.0 }
  0xc4   :  { %v249_v46 = vmax.f32 %v160_v44, 0.0 }
  0xc5   :  { %v264_v47 = vpack.c.bf16 %v248_v45, %v244_v40 }
  0xc6   :  { %v265_v49 = vpack.c.bf16 %v249_v46, %v245_v43 }
  0xc7   :  { %v188_v51 = vpop.f32.mrf.mxu2  ;;  %551 = vmatmul.bf16.gmra.mxu0 %v264_v47 }
  0xc8   :  { %v189_v52 = vadd.f32 %v188_v51, %v1098_v18  ;;  %v217_v53 = vpop.f32.mrf.mxu3  ;;  %580 = vmatmul.bf16.gmra.mxu1 %v265_v49 }
  0xc9   :  { %v218_v6 = vadd.f32 %v217_v53, %v1101_v20 }
  0xca   :  { %v250_v55 = vmax.f32 %v189_v52, 0.0 }
  0xcb   :  { %v251_v8 = vmax.f32 %v218_v6, 0.0 }
  0xcc   :  { %v266_v57 = vpack.c.bf16 %v250_v55, %v246_v54 }
  0xcd   :  { %v267_v58 = vpack.c.bf16 %v251_v8, %v247_v56 }
  0xce   :  { %609 = vmatmul.bf16.gmra.mxu2 %v266_v57 }
  0xcf   :  { %638 = vmatmul.bf16.gmra.mxu3 %v267_v58 }
 0x114   :  { %v537_v59 = vpop.f32.mrf.mxu0 }
 0x115   :  { %v566_v60 = vpop.f32.mrf.mxu1  ;;  %v538_v18 = vadd.f32 %v1134_v61, %v537_v59 }
 0x117   :  { %v567_v20 = vadd.f32 %v566_v60, %v538_v18 }
 0x11c   :  { %v539_v62 = vpop.f32.mrf.mxu0 }
 0x11d   :  { %v568_v63 = vpop.f32.mrf.mxu1  ;;  %v540_v3 = vadd.f32 %v1134_v61, %v539_v62 }
 0x11f   :  { %v569_v9 = vadd.f32 %v568_v63, %v540_v3 }
 0x121   :  { %v595_v0 = vpop.f32.mrf.mxu2 }
 0x122   :  { %v596_v1 = vadd.f32 %v595_v0, %v567_v20  ;;  %v624_v2 = vpop.f32.mrf.mxu3 }
 0x124   :  { %v625_v4 = vadd.f32 %v624_v2, %v596_v1  ;;  %v542_v5 = vpop.f32.mrf.mxu0 }
 0x125   :  { %v571_v7 = vpop.f32.mrf.mxu1  ;;  %v543_v13 = vadd.f32 %v1134_v61, %v542_v5 }
 0x126   :  { %645 = vst.msk [vmem:[%s1181_s5] sm:$0xff] %vm644_vm1, %v625_v4 }
 0x127   :  { %v572_v17 = vadd.f32 %v571_v7, %v543_v13 }
 0x129   :  { %v597_v10 = vpop.f32.mrf.mxu2 }
 0x12a   :  { %v598_v11 = vadd.f32 %v597_v10, %v569_v9  ;;  %v626_v12 = vpop.f32.mrf.mxu3 }
 0x12c   :  { %v627_v14 = vadd.f32 %v626_v12, %v598_v11  ;;  %v544_v15 = vpop.f32.mrf.mxu0 }
 0x12d   :  { %v573_v16 = vpop.f32.mrf.mxu1  ;;  %v545_v23 = vadd.f32 %v1134_v61, %v544_v15 }
 0x12e   :  { %646 = vst.msk [vmem:[%s1181_s5 + $0x8] sm:$0xff] %vm644_vm1, %v627_v14 }
 0x12f   :  { %v574_v26 = vadd.f32 %v573_v16, %v545_v23 }
 0x131   :  { %v600_v19 = vpop.f32.mrf.mxu2 }
 0x132   :  { %v601_v21 = vadd.f32 %v600_v19, %v572_v17  ;;  %v629_v22 = vpop.f32.mrf.mxu3 }
 0x134   :  { %v630_v24 = vadd.f32 %v629_v22, %v601_v21  ;;  %v547_v25 = vpop.f32.mrf.mxu0 }
 0x135   :  { %v576_v27 = vpop.f32.mrf.mxu1  ;;  %v548_v31 = vadd.f32 %v1134_v61, %v547_v25 }
 0x136   :  { %647 = vst.msk [vmem:[%s1181_s5 + $0x10] sm:$0xff] %vm644_vm1, %v630_v24 }
 0x137   :  { %v577_v34 = vadd.f32 %v576_v27, %v548_v31 }
 0x139   :  { %v602_v28 = vpop.f32.mrf.mxu2 }
 0x13a   :  { %v603_v29 = vadd.f32 %v602_v28, %v574_v26  ;;  %v631_v30 = vpop.f32.mrf.mxu3 }
 0x13c   :  { %v632_v32 = vadd.f32 %v631_v30, %v603_v29  ;;  %v549_v33 = vpop.f32.mrf.mxu0 }
 0x13d   :  { %v578_v38 = vpop.f32.mrf.mxu1  ;;  %v550_v39 = vadd.f32 %v1134_v61, %v549_v33 }
 0x13e   :  { %648 = vst.msk [vmem:[%s1181_s5 + $0x18] sm:$0xff] %vm644_vm1, %v632_v32 }
 0x13f   :  { %v579_v42 = vadd.f32 %v578_v38, %v550_v39 }
 0x141   :  { %v605_v35 = vpop.f32.mrf.mxu2 }
 0x142   :  { %v606_v36 = vadd.f32 %v605_v35, %v577_v34  ;;  %v634_v37 = vpop.f32.mrf.mxu3 }
 0x144   :  { %v635_v40 = vadd.f32 %v634_v37, %v606_v36  ;;  %v552_v41 = vpop.f32.mrf.mxu0 }
 0x145   :  { %v553_v46 = vadd.f32 %v1134_v61, %v552_v41  ;;  %v581_v48 = vpop.f32.mrf.mxu1 }
 0x146   :  { %649 = vst.msk [vmem:[%s1181_s5 + $0x20] sm:$0xff] %vm644_vm1, %v635_v40 }
 0x147   :  { %v582_v49 = vadd.f32 %v581_v48, %v553_v46 }
 0x149   :  { %v607_v43 = vpop.f32.mrf.mxu2 }
 0x14a   :  { %v608_v44 = vadd.f32 %v607_v43, %v579_v42  ;;  %v636_v45 = vpop.f32.mrf.mxu3 }
 0x14c   :  { %v637_v47 = vadd.f32 %v636_v45, %v608_v44  ;;  %v554_v50 = vpop.f32.mrf.mxu0 }
 0x14d   :  { %v555_v6 = vadd.f32 %v1134_v61, %v554_v50  ;;  %v583_v55 = vpop.f32.mrf.mxu1 }
 0x14e   :  { %650 = vst.msk [vmem:[%s1181_s5 + $0x28] sm:$0xff] %vm644_vm1, %v637_v47 }
 0x14f   :  { %v584_v56 = vadd.f32 %v583_v55, %v555_v6 }
 0x151   :  { %v610_v51 = vpop.f32.mrf.mxu2 }
 0x152   :  { %v611_v52 = vadd.f32 %v610_v51, %v582_v49  ;;  %v639_v53 = vpop.f32.mrf.mxu3 }
 0x154   :  { %v640_v54 = vadd.f32 %v639_v53, %v611_v52 }
 0x156   :  { %651 = vst.msk [vmem:[%s1181_s5 + $0x30] sm:$0xff] %vm644_vm1, %v640_v54 }
 0x159   :  { %v612_v8 = vpop.f32.mrf.mxu2 }
 0x15a   :  { %v613_v57 = vadd.f32 %v612_v8, %v584_v56  ;;  %v641_v58 = vpop.f32.mrf.mxu3 }
 0x15c   :  { %v642_v59 = vadd.f32 %v641_v58, %v613_v57 }
 0x15e   :  { %652 = vst.msk [vmem:[%s1181_s5 + $0x38] sm:$0xff] %vm644_vm1, %v642_v59 }

</bundles_post_ra>
